<compile_context>
chip_gen: v7x
topology: tpu7x:2x2x1
jax: 0.10.0
libtpu: 0.0.40
codegen_flags: <defaults>
</compile_context>

<pallas_src>
import functools

import numpy as np
import jax
import jax.numpy as jnp
from jax.experimental import pallas as pl
from jax.experimental.pallas import tpu as pltpu


# ---------------------------------------------------------------------------
# align_corners=True interpolation matrix (numpy, trace-time constant)
# ---------------------------------------------------------------------------
def _interp_matrix(n_in, n_out):
    m = np.zeros((n_out, n_in), np.float32)
    if n_in == 1:
        m[:, 0] = 1.0
        return m
    src = np.arange(n_out, dtype=np.float64) * (n_in - 1) / (n_out - 1)
    i0 = np.clip(np.floor(src).astype(np.int64), 0, n_in - 2)
    frac = (src - i0).astype(np.float32)
    rows = np.arange(n_out)
    m[rows, i0] = 1.0 - frac
    m[rows, i0 + 1] += frac
    return m


def _pick_tile(dim, candidates):
    for c in candidates:
        if dim >= c and dim % c == 0:
            return c
    return dim  # full-extent block (always legal, no padding needed)


# ---------------------------------------------------------------------------
# Kernel bodies
# ---------------------------------------------------------------------------
def _store_or_accumulate(o_ref, partial, b_ref, resid_fn, nk):
    """k==0: store; middle k: accumulate; last k: fold bias + residual epilogue."""
    if nk == 1:  # single-K fast path: one fused store, no extra o_ref passes
        o_ref[0] = partial + b_ref[...] + resid_fn()
        return

    k = pl.program_id(3)

    @pl.when(k == 0)
    def _():
        o_ref[0] = partial

    @pl.when(jnp.logical_and(k > 0, k < nk - 1))
    def _():
        o_ref[0] = o_ref[0] + partial

    @pl.when(k == nk - 1)
    def _():
        o_ref[0] = o_ref[0] + partial + b_ref[...] + resid_fn()


def _fused_kernel(w_ref, x_ref, b_ref, low_ref, u_ref, o_ref, *, nk):
    # Conv1x1 partial product on the MXU (bf16 operands, f32 accumulate).
    partial = jnp.dot(w_ref[...], x_ref[0].astype(jnp.bfloat16),
                      preferred_element_type=jnp.float32)

    def resid():
        # Fused bilinear x2 upsample: low (tco, Hi*Wi) @ kron(Uh, Uw) (Hi*Wi, tp).
        return jnp.dot(low_ref[0].astype(jnp.bfloat16), u_ref[...],
                       preferred_element_type=jnp.float32)

    _store_or_accumulate(o_ref, partial, b_ref, resid, nk)


def _residual_kernel(w_ref, x_ref, b_ref, r_ref, o_ref, *, nk):
    partial = jnp.dot(w_ref[...], x_ref[0].astype(jnp.bfloat16),
                      preferred_element_type=jnp.float32)

    def resid():
        return r_ref[0].astype(jnp.float32)

    _store_or_accumulate(o_ref, partial, b_ref, resid, nk)


# ---------------------------------------------------------------------------
# Forward pass (NCHW in / NCHW out, like the PyTorch module)
# ---------------------------------------------------------------------------
_FUSE_U_BYTES_LIMIT = 2 * 1024 * 1024  # max bf16 kron-matrix size kept in the kernel


def feature_pyramid_forward(params, high, low):
    """high: (N, Cin, H, W) f32; low: (N, Cout, H//2, W//2) f32 -> (N, Cout, H, W) f32."""
    N, Cin, H, W = high.shape
    Nl, Cout, Hi, Wi = low.shape
    Ho, Wo = 2 * Hi, 2 * Wi
    assert Nl == N and (Ho, Wo) == (H, W), "high must be 2x the low-layer spatial size"
    P, Pin = H * W, Hi * Wi

    wm = params["wm"].astype(jnp.bfloat16)                # (Cout, Cin), tiny cast
    bias = params["b"].astype(jnp.float32).reshape(Cout, 1)
    x = high.reshape(N, Cin, P)                           # free reshape (contiguous)

    uh = _interp_matrix(Hi, Ho)                           # (Ho, Hi) numpy constant
    uw = _interp_matrix(Wi, Wo)                           # (Wo, Wi) numpy constant

    # ---- tiles: divide true extents (no padding); lane-dense up to 512 --------
    tp = _pick_tile(P, (512, 256, 128))
    tco = _pick_tile(Cout, (256, 128))
    tk = _pick_tile(Cin, (512, 256, 128))
    if N * (Cout // tco) * (P // tp) < 2:                 # keep >=2 parallel blocks (v7x megacore)
        if tp % 256 == 0:
            tp //= 2
        elif tco % 16 == 0:
            tco //= 2
    nk = Cin // tk
    grid = (N, Cout // tco, P // tp, nk)

    common_specs = [
        pl.BlockSpec((tco, tk), lambda n, j, p, k: (j, k)),       # weight (Cout, Cin)
        pl.BlockSpec((1, tk, tp), lambda n, j, p, k: (n, k, p)),  # activations (N, Cin, P)
        pl.BlockSpec((tco, 1), lambda n, j, p, k: (j, 0)),        # bias (Cout, 1)
    ]
    out_spec = pl.BlockSpec((1, tco, tp), lambda n, j, p, k: (n, j, p))

    fuse = 2 * Pin * P <= _FUSE_U_BYTES_LIMIT
    if fuse:
        # In-kernel residual: res = low @ kron(Uh, Uw); no HBM materialization.
        u_kron = np.einsum("oh,vw->hwov", uh, uw).reshape(Pin, P)
        kernel = functools.partial(_fused_kernel, nk=nk)
        extra_in = (low.reshape(N, Cout, Pin),
                    jnp.asarray(u_kron, dtype=jnp.bfloat16))
        extra_specs = [
            pl.BlockSpec((1, tco, Pin), lambda n, j, p, k: (n, j, 0)),  # low (per n, cout-block)
            pl.BlockSpec((Pin, tp), lambda n, j, p, k: (0, p)),         # kron interp matrix
        ]
    else:
        # TODO(synk): very large low-res levels use a bf16-materialized residual
        # (two XLA matmuls, NCHW) instead of in-kernel fusion.
        t = jnp.einsum("nchw,vw->nchv", low, jnp.asarray(uw, low.dtype))
        up = jnp.einsum("oh,nchv->ncov", jnp.asarray(uh, low.dtype), t)
        kernel = functools.partial(_residual_kernel, nk=nk)
        extra_in = (up.reshape(N, Cout, P).astype(jnp.bfloat16),)
        extra_specs = [pl.BlockSpec((1, tco, tp), lambda n, j, p, k: (n, j, p))]

    out = pl.pallas_call(
        kernel,
        out_shape=jax.ShapeDtypeStruct((N, Cout, P), jnp.float32),
        grid_spec=pltpu.PrefetchScalarGridSpec(
            num_scalar_prefetch=0,
            grid=grid,
            in_specs=common_specs + extra_specs,
            out_specs=out_spec,
        ),
        compiler_params=pltpu.CompilerParams(
            dimension_semantics=("parallel", "parallel", "parallel", "arbitrary"),
        ),
    )(wm, x, bias, *extra_in)

    return out.reshape(N, Cout, H, W)                     # free reshape (contiguous)


# ---------------------------------------------------------------------------
# Parameters (PyTorch nn.Conv2d default init); weight kept as (Cout, Cin)
# ---------------------------------------------------------------------------
def init_params(key, in_planes, out_planes):
    kw, kb = jax.random.split(key)
    bound = 1.0 / (in_planes ** 0.5)
    w = jax.random.uniform(kw, (out_planes, in_planes, 1, 1), jnp.float32, -bound, bound)
    b = jax.random.uniform(kb, (out_planes,), jnp.float32, -bound, bound)
    return {"w": w, "wm": w.reshape(out_planes, in_planes), "b": b}


# ---------------------------------------------------------------------------
# Pure-JAX f32 reference (independent gather/lerp upsample) for validation
# ---------------------------------------------------------------------------
def _bilinear_up2_ref(x):  # NCHW, x2, align_corners=True
    N, C, H, W = x.shape
    Ho, Wo = 2 * H, 2 * W

    def coords(n_in, n_out):
        if n_in == 1:
            z = jnp.zeros((n_out,), jnp.int32)
            return jnp.zeros((n_out,), jnp.float32), z, z
        src = jnp.arange(n_out, dtype=jnp.float32) * (n_in - 1) / (n_out - 1)
        i0 = jnp.clip(jnp.floor(src).astype(jnp.int32), 0, n_in - 2)
        return src - i0.astype(jnp.float32), i0, i0 + 1

    fh, h0, h1 = coords(H, Ho)
    fw, w0, w1 = coords(W, Wo)
    xh = (x[:, :, h0, :] * (1.0 - fh)[None, None, :, None]
          + x[:, :, h1, :] * fh[None, None, :, None])
    return (xh[:, :, :, w0] * (1.0 - fw)[None, None, None, :]
            + xh[:, :, :, w1] * fw[None, None, None, :])


def _reference(params, high, low):
    conv = jnp.einsum("oi,nihw->nohw", params["wm"], high)
    return conv + params["b"][None, :, None, None] + _bilinear_up2_ref(low)


# ---------------------------------------------------------------------------
if __name__ == "__main__":
    fwd = jax.jit(feature_pyramid_forward)

    configs = [
        # (in_planes, out_planes, batch, H, W)
        (64, 128, 2, 16, 16),   # fused residual, single-K fast path
        (640, 128, 1, 16, 16),  # fused residual, multi-K accumulation branches
        (32, 64, 1, 48, 48),    # bf16-materialized residual fallback (large low spatial)
    ]

    key = jax.random.PRNGKey(0)
    for idx, (cin, cout, nb, h, w) in enumerate(configs):
        key, kp, kh, kl = jax.random.split(key, 4)
        params = init_params(kp, cin, cout)
        high = jax.random.normal(kh, (nb, cin, h, w), jnp.float32)
        low = jax.random.normal(kl, (nb, cout, h // 2, w // 2), jnp.float32)

        y = fwd(params, high, low)
        jax.block_until_ready(y)

        assert y.shape == (nb, cout, h, w), (idx, y.shape)
        assert bool(jnp.all(jnp.isfinite(y))), idx

        ref = _reference(params, high, low)
        err = float(jnp.max(jnp.abs(y - ref)))
        assert err < 5e-2, f"config {idx}: max abs err {err}"

    print("KERNEL_OK")
</pallas_src>

<mosaic_0001>
module attributes {stable_mosaic.version = 11 : i64} {
  func.func @_fused_kernel(%arg0: i32, %arg1: i32, %arg2: i32, %arg3: i32, %arg4: memref<128x64xbf16, #tpu.memory_space<vmem>>, %arg5: memref<1x64x256xf32, #tpu.memory_space<vmem>>, %arg6: memref<128x1xf32, #tpu.memory_space<vmem>>, %arg7: memref<1x128x64xf32, #tpu.memory_space<vmem>>, %arg8: memref<64x256xbf16, #tpu.memory_space<vmem>>, %arg9: memref<1x128x256xf32, #tpu.memory_space<vmem>>) attributes {dimension_semantics = [#tpu.dimension_semantics<parallel>, #tpu.dimension_semantics<parallel>, #tpu.dimension_semantics<parallel>, #tpu.dimension_semantics<arbitrary>], iteration_bounds = array<i64: 2, 1, 1, 1>, scalar_prefetch = 0 : i64, scratch_operands = 0 : i64, tpu.core_type = #tpu.core_type<tc>, window_params = [{transform_indices = @transform_0, window_bounds = array<i64: 128, 64>}, {transform_indices = @transform_1, window_bounds = array<i64: 1, 64, 256>}, {transform_indices = @transform_2, window_bounds = array<i64: 128, 1>}, {transform_indices = @transform_3, window_bounds = array<i64: 1, 128, 64>}, {transform_indices = @transform_4, window_bounds = array<i64: 64, 256>}, {transform_indices = @transform_5, window_bounds = array<i64: 1, 128, 256>}]} {
    %c0 = arith.constant 0 : index
    %c0_0 = arith.constant 0 : index
    %0 = vector.load %arg4[%c0, %c0_0] : memref<128x64xbf16, #tpu.memory_space<vmem>>, vector<128x64xbf16>
    %c0_1 = arith.constant 0 : index
    %c0_2 = arith.constant 0 : index
    %c0_3 = arith.constant 0 : index
    %1 = vector.load %arg5[%c0_1, %c0_2, %c0_3] : memref<1x64x256xf32, #tpu.memory_space<vmem>>, vector<1x64x256xf32>
    %2 = vector.shape_cast %1 : vector<1x64x256xf32> to vector<64x256xf32>
    %3 = arith.truncf %2 : vector<64x256xf32> to vector<64x256xbf16>
    %cst = arith.constant dense<0.000000e+00> : vector<128x256xf32>
    %4 = tpu.matmul %0, %3, %cst {dimension_numbers = #tpu.dot_dimension_numbers<[1], [0], [0], [1], [0, 0, 1, 1], [], []>} : vector<128x64xbf16>, vector<64x256xbf16>, vector<128x256xf32> -> vector<128x256xf32>
    %c0_4 = arith.constant 0 : index
    %c0_5 = arith.constant 0 : index
    %5 = vector.load %arg6[%c0_4, %c0_5] : memref<128x1xf32, #tpu.memory_space<vmem>>, vector<128x1xf32>
    %6 = vector.broadcast %5 : vector<128x1xf32> to vector<128x256xf32>
    %7 = arith.addf %4, %6 : vector<128x256xf32>
    %c0_6 = arith.constant 0 : index
    %c0_7 = arith.constant 0 : index
    %c0_8 = arith.constant 0 : index
    %8 = vector.load %arg7[%c0_6, %c0_7, %c0_8] : memref<1x128x64xf32, #tpu.memory_space<vmem>>, vector<1x128x64xf32>
    %9 = vector.shape_cast %8 : vector<1x128x64xf32> to vector<128x64xf32>
    %10 = arith.truncf %9 : vector<128x64xf32> to vector<128x64xbf16>
    %c0_9 = arith.constant 0 : index
    %c0_10 = arith.constant 0 : index
    %11 = vector.load %arg8[%c0_9, %c0_10] : memref<64x256xbf16, #tpu.memory_space<vmem>>, vector<64x256xbf16>
    %cst_11 = arith.constant dense<0.000000e+00> : vector<128x256xf32>
    %12 = tpu.matmul %10, %11, %cst_11 {dimension_numbers = #tpu.dot_dimension_numbers<[1], [0], [0], [1], [0, 0, 1, 1], [], []>} : vector<128x64xbf16>, vector<64x256xbf16>, vector<128x256xf32> -> vector<128x256xf32>
    %13 = arith.addf %7, %12 : vector<128x256xf32>
    %c0_12 = arith.constant 0 : index
    %c0_13 = arith.constant 0 : index
    %c0_14 = arith.constant 0 : index
    %14 = vector.load %arg9[%c0_12, %c0_13, %c0_14] : memref<1x128x256xf32, #tpu.memory_space<vmem>>, vector<1x128x256xf32>
    %15 = vector.shape_cast %14 : vector<1x128x256xf32> to vector<128x256xf32>
    %16 = vector.shape_cast %13 : vector<128x256xf32> to vector<1x128x256xf32>
    tpu.vector_store %arg9[%c0_12, %c0_13, %c0_14], %16 {strides = array<i32>} : memref<1x128x256xf32, #tpu.memory_space<vmem>>, vector<1x128x256xf32>,
    return
  }
  func.func @transform_0(%arg0: i32, %arg1: i32, %arg2: i32, %arg3: i32) -> (i32, i32) {
    %c0_i32 = arith.constant 0 : i32
    return %arg1, %arg3 : i32, i32
  }
  func.func @transform_1(%arg0: i32, %arg1: i32, %arg2: i32, %arg3: i32) -> (i32, i32, i32) {
    %c0_i32 = arith.constant 0 : i32
    return %arg0, %arg3, %arg2 : i32, i32, i32
  }
  func.func @transform_2(%arg0: i32, %arg1: i32, %arg2: i32, %arg3: i32) -> (i32, i32) {
    %c0_i32 = arith.constant 0 : i32
    %c0_i32_0 = arith.constant 0 : i32
    return %arg1, %c0_i32 : i32, i32
  }
  func.func @transform_3(%arg0: i32, %arg1: i32, %arg2: i32, %arg3: i32) -> (i32, i32, i32) {
    %c0_i32 = arith.constant 0 : i32
    %c0_i32_0 = arith.constant 0 : i32
    return %arg0, %arg1, %c0_i32 : i32, i32, i32
  }
  func.func @transform_4(%arg0: i32, %arg1: i32, %arg2: i32, %arg3: i32) -> (i32, i32) {
    %c0_i32 = arith.constant 0 : i32
    %c0_i32_0 = arith.constant 0 : i32
    return %c0_i32, %arg2 : i32, i32
  }
  func.func @transform_5(%arg0: i32, %arg1: i32, %arg2: i32, %arg3: i32) -> (i32, i32, i32) {
    %c0_i32 = arith.constant 0 : i32
    return %arg0, %arg1, %arg2 : i32, i32, i32
  }
}

</mosaic_0001>

<bundles_post_ra>
// kernel: feature_pyramid_forward.1
= control target key start
LH: loop header
LB: loop body
LE: loop exit
PB: predicated region body
PF: predicated region fallthrough
CT: control target
= control target key end

     0   :  { %s1412_s18 = smov 0   ;;  %s1414_s19 = smov 0   ;;  %s1652_s0 = inlined_call_operand.vmem [shape: bf16[128,64], index: 0, kind: input, shape index: {}]   ;;  %s1653_s1 = inlined_call_operand.vmem [shape: f32[2,64,256], index: 1, kind: input, shape index: {}]   ;;  %s1654_s2 = inlined_call_operand.vmem [shape: f32[128,1], index: 2, kind: input, shape index: {}]   ;;  %s1655_s3 = inlined_call_operand.vmem [shape: f32[2,128,64], index: 3, kind: input, shape index: {}]   ;;  %s1656_s4 = inlined_call_operand.vmem [shape: bf16[64,256], index: 4, kind: input, shape index: {}]   ;;  %s1657_s5 = inlined_call_operand.vmem [shape: f32[2,128,256], index: 5, kind: output, shape index: {}]  }
   0x1   :  { %s1416_s20 = smov 0  }
   0x2 LB: > { %s41_s21 = sadd.s32 1, %s1375_s19  ;;  %p1202_p0 = scmp.ge.s32.totalorder %s1379_s20, 1  ;;  %s1379_s20 = sphi %s1416_s20, %s15_s20   ;;  %s1375_s19 = sphi %s1414_s19, %s1659_s19   ;;  %s1371_s18 = sphi %s1412_s18, %s1658_s18  }
   0x3   : > { %p43_p1 = scmp.ge.s32.totalorder %s41_s21, 2  ;;  %p287_p2 = scmp.lt.s32.totalorder %s1379_s20, 3 }
   0x5   : > { %s1661_s21 = smov (%p43_p1, %s41_s21), 0  ;;  %p288_p3 = pnand %p1202_p0, %p287_p2 }
   0x6   : > { %v1337_v0 = vld [vmem:[%s1656_s4 + $0x4] ss:$8 sps:$4 sm:$0xff] (!%p288_p3)   ;;  %p371_p4 = scmp.lt.s32.totalorder (!%p288_p3), %s1371_s18, 1  ;;  %v1339_v1 = vld [vmem:[%s1656_s4] ss:$8 sps:$4 sm:$0xff] (!%p288_p3)   ;;  %v1381_v2 = vmov (!%p288_p3), 0  }
   0x7   : > { %291 = sbr.rel (%p288_p3) target bundleno = 312 (0x138), region = 40  ;;  %866 = vmatprep.mubr.bf16.mxu0 (!%p288_p3), %v1381_v2  ;;  %657 = vmatprep.mubr.bf16.mxu1 (!%p288_p3), %v1381_v2  ;;  %v1340_v3 = vld [vmem:[%s1656_s4 + $0x14] ss:$8 sps:$4 sm:$0xff] (!%p288_p3)   ;;  %v1342_v4 = vld [vmem:[%s1656_s4 + $0x10] ss:$8 sps:$4 sm:$0xff] (!%p288_p3)   ;;  %vm600_vm0 = vcmask (!%p288_p3), 523264  }
   0x8   : > { %834 = vmatprep.subr.bf16.mxu0 (!%p288_p3), %v1337_v0  ;;  %1335 = vset.pattern.permute.xlu0 (!%p288_p3), %v1381_v2  ;;  %v1343_v5 = vld [vmem:[%s1656_s4 + $0x24] ss:$8 sps:$4 sm:$0xff] (!%p288_p3)   ;;  %v1345_v6 = vld [vmem:[%s1656_s4 + $0x20] ss:$8 sps:$4 sm:$0xff] (!%p288_p3)   ;;  %v1346_v10 = vld [vmem:[%s1656_s4 + $0x34] ss:$8 sps:$4 sm:$0xff] (!%p288_p3)  }
   0x9   : > { %835 = vmatpush1.bf16.msra.mxu0 (!%p288_p3), %v1339_v1  ;;  %1336 = vset.pattern.permute.xlu1 (!%p288_p3), %v1381_v2  ;;  %v1348_v23 = vld [vmem:[%s1656_s4 + $0x30] ss:$8 sps:$4 sm:$0xff] (!%p288_p3)   ;;  %v1349_v38 = vld [vmem:[%s1652_s0] sm:$0xff] (!%p288_p3)   ;;  %v465_v42 = vld [vmem:[%s1654_s2 + $0x8] sm:$0xff] (!%p288_p3) }
   0xa   : > { %836 = vmatprep.subr.bf16.mxu0 (!%p288_p3), %v1340_v3  ;;  %v464_v40 = vld [vmem:[%s1654_s2] sm:$0xff] (!%p288_p3)  ;;  %v466_v41 = vld [vmem:[%s1654_s2 + $0x10] sm:$0xff] (!%p288_p3)  ;;  %v467_v45 = vld [vmem:[%s1654_s2 + $0x18] sm:$0xff] (!%p288_p3) }
   0xb   : > { %482 = vperm.xlu0 (!%p288_p3), %1335, %v464_v40   ;;  %492 = vperm.xlu1 (!%p288_p3), %1336, %v466_v41   ;;  %v1350_v46 = vld [vmem:[%s1652_s0 + $0x8] sm:$0xff] (!%p288_p3)   ;;  %v468_v48 = vld [vmem:[%s1654_s2 + $0x20] sm:$0xff] (!%p288_p3)  ;;  %v470_v50 = vld [vmem:[%s1654_s2 + $0x30] sm:$0xff] (!%p288_p3) }
   0xc   : > { %v469_v49 = vld [vmem:[%s1654_s2 + $0x28] sm:$0xff] (!%p288_p3)  ;;  %v471_v53 = vld [vmem:[%s1654_s2 + $0x38] sm:$0xff] (!%p288_p3)  ;;  %v1351_v54 = vld [vmem:[%s1652_s0 + $0x10] sm:$0xff] (!%p288_p3)  }
   0xd   : > { %837 = vmatpush1.bf16.msra.mxu0 (!%p288_p3), %v1342_v4  ;;  %v472_v56 = vld [vmem:[%s1654_s2 + $0x40] sm:$0xff] (!%p288_p3)  ;;  %v473_v57 = vld [vmem:[%s1654_s2 + $0x48] sm:$0xff] (!%p288_p3)  ;;  %v474_v58 = vld [vmem:[%s1654_s2 + $0x50] sm:$0xff] (!%p288_p3) }
   0xe   : > { %s1663_s18 = smov (!%p371_p4, %s1371_s18), 1  ;;  %838 = vmatprep.subr.bf16.mxu0 %v1343_v5  ;;  %v475_v61 = vld [vmem:[%s1654_s2 + $0x58] sm:$0xff]  ;;  %v476_v0 = vld [vmem:[%s1654_s2 + $0x60] sm:$0xff]  ;;  %v477_v1 = vld [vmem:[%s1654_s2 + $0x68] sm:$0xff] }
   0xf   : > { %s1243_s30 = sshll.u32 %s1663_s18, 7  ;;  %487 = vperm.xlu0 %1335, %v465_v42   ;;  %497 = vperm.xlu1 %1336, %v467_v45   ;;  %v1352_v62 = vld [vmem:[%s1652_s0 + $0x18] sm:$0xff]   ;;  %v478_v3 = vld [vmem:[%s1654_s2 + $0x70] sm:$0xff] }
  0x10   : > { %s1455_s10 = scalar_lea.vmem %s1653_s1, %s1243_s30  ;;  %s1472_s17 = scalar_lea.vmem %s1655_s3, %s1243_s30 }
  0x11   : > { %v441_v7 = vld [vmem:[%s1455_s10 + $0x8] sm:$0xff]  ;;  %v443_v8 = vld [vmem:[%s1455_s10 + $0x18] sm:$0xff]  ;;  %v440_v9 = vld [vmem:[%s1455_s10] sm:$0xff]  ;;  %839 = vmatpush1.bf16.msra.mxu0 %v1345_v6 }
  0x12   : > { %v457_v11 = vpack.c.bf16 %v443_v8, %v441_v7  ;;  %v442_v12 = vld [vmem:[%s1455_s10 + $0x10] sm:$0xff]  ;;  %v445_v13 = vld [vmem:[%s1455_s10 + $0x28] sm:$0xff]  ;;  %v447_v14 = vld [vmem:[%s1455_s10 + $0x38] sm:$0xff]  ;;  %840 = vmatprep.subr.bf16.mxu0 %v1346_v10 }
  0x13   : > { %v456_v15 = vpack.c.bf16 %v442_v12, %v440_v9  ;;  %v459_v16 = vpack.c.bf16 %v447_v14, %v445_v13  ;;  %v444_v17 = vld [vmem:[%s1455_s10 + $0x20] sm:$0xff]  ;;  %v446_v18 = vld [vmem:[%s1455_s10 + $0x30] sm:$0xff]  ;;  %v449_v19 = vld [vmem:[%s1455_s10 + $0x48] sm:$0xff]  ;;  %502 = vperm.xlu0 %1335, %v468_v48   ;;  %507 = vperm.xlu1 %1336, %v469_v49  }
  0x14   : > { %625 = vmatprep.subr.bf16.mxu1 %v457_v11  ;;  %v451_v20 = vld [vmem:[%s1455_s10 + $0x58] sm:$0xff]  ;;  %v458_v21 = vpack.c.bf16 %v446_v18, %v444_v17  ;;  %v448_v22 = vld [vmem:[%s1455_s10 + $0x40] sm:$0xff]  ;;  %v450_v25 = vld [vmem:[%s1455_s10 + $0x50] sm:$0xff] }
  0x15   : > { %626 = vmatpush1.bf16.msra.mxu1 %v456_v15  ;;  %v461_v24 = vpack.c.bf16 %v451_v20, %v449_v19  ;;  %v738_v26 = vld [vmem:[%s1472_s17] sm:$0xff]  ;;  %v739_v27 = vld [vmem:[%s1472_s17 + $0x8] sm:$0xff]  ;;  %v455_v29 = vld [vmem:[%s1455_s10 + $0x78] sm:$0xff]  ;;  %v460_v30 = vpack.c.bf16 %v450_v25, %v448_v22  ;;  %841 = vmatpush1.bf16.msra.mxu0 %v1348_v23 }
  0x16   : > { %627 = vmatprep.subr.bf16.mxu1 %v459_v16  ;;  %v453_v28 = vld [vmem:[%s1455_s10 + $0x68] sm:$0xff]  ;;  %v754_v31 = vpack.c.bf16 %v739_v27, %v738_v26  ;;  %v452_v33 = vld [vmem:[%s1455_s10 + $0x60] sm:$0xff]  ;;  %v454_v34 = vld [vmem:[%s1455_s10 + $0x70] sm:$0xff] }
  0x17   : > { %v463_v32 = vpack.c.bf16 %v455_v29, %v453_v28  ;;  %v462_v35 = vpack.c.bf16 %v454_v34, %v452_v33  ;;  %v740_v36 = vld [vmem:[%s1472_s17 + $0x10] sm:$0xff]  ;;  %v741_v37 = vld [vmem:[%s1472_s17 + $0x18] sm:$0xff]  ;;  %v742_v43 = vld [vmem:[%s1472_s17 + $0x20] sm:$0xff]  ;;  %512 = vperm.xlu0 %1335, %v470_v50   ;;  %517 = vperm.xlu1 %1336, %v471_v53  }
  0x18   : > { %1233 = vmatmul.mubr.msk.bf16.vlgmr.msra.gmra.mrb[0].mxu0 %vm600_vm0, %v754_v31  ;;  %v755_v39 = vpack.c.bf16 %v741_v37, %v740_v36  ;;  %v743_v44 = vld [vmem:[%s1472_s17 + $0x28] sm:$0xff]  ;;  %v744_v51 = vld [vmem:[%s1472_s17 + $0x30] sm:$0xff]  ;;  %v745_v52 = vld [vmem:[%s1472_s17 + $0x38] sm:$0xff] }
  0x19   : > { %628 = vmatpush1.bf16.msra.mxu1 %v458_v21  ;;  %876 = vmatprep.mubr.bf16.mxu0 %v1381_v2  ;;  %v756_v47 = vpack.c.bf16 %v743_v44, %v742_v43  ;;  %v757_v55 = vpack.c.bf16 %v745_v52, %v744_v51  ;;  %v746_v59 = vld [vmem:[%s1472_s17 + $0x40] sm:$0xff]  ;;  %v747_v60 = vld [vmem:[%s1472_s17 + $0x48] sm:$0xff]  ;;  %v748_v4 = vld [vmem:[%s1472_s17 + $0x50] sm:$0xff] }
  0x1a   : > { %629 = vmatprep.subr.bf16.mxu1 %v461_v24  ;;  %v758_v63 = vpack.c.bf16 %v747_v60, %v746_v59  ;;  %v749_v5 = vld [vmem:[%s1472_s17 + $0x58] sm:$0xff]  ;;  %v1353_v7 = vld [vmem:[%s1652_s0 + $0x20] sm:$0xff]   ;;  %v751_v10 = vld [vmem:[%s1472_s17 + $0x68] sm:$0xff] }
  0x1b   : > { %522 = vperm.xlu0 %1335, %v472_v56   ;;  %527 = vperm.xlu1 %1336, %v473_v57   ;;  %v479_v6 = vld [vmem:[%s1654_s2 + $0x78] sm:$0xff]  ;;  %v759_v8 = vpack.c.bf16 %v749_v5, %v748_v4  ;;  %v750_v9 = vld [vmem:[%s1472_s17 + $0x60] sm:$0xff]  ;;  %v1354_v11 = vld [vmem:[%s1652_s0 + $0x28] sm:$0xff]  }
  0x1c   : > { %v760_v12 = vpack.c.bf16 %v751_v10, %v750_v9  ;;  %v752_v13 = vld [vmem:[%s1472_s17 + $0x70] sm:$0xff]  ;;  %v753_v14 = vld [vmem:[%s1472_s17 + $0x78] sm:$0xff]  ;;  %s1245_s17 = sshll.u32 %s1663_s18, 8 }
  0x1d   : > { %630 = vmatpush1.bf16.msra.mxu1 %v460_v30  ;;  %v1355_v15 = vld [vmem:[%s1652_s0 + $0x30] sm:$0xff]   ;;  %v761_v16 = vpack.c.bf16 %v753_v14, %v752_v13  ;;  %v1356_v17 = vld [vmem:[%s1652_s0 + $0x38] sm:$0xff]   ;;  %s1609_s9 = scalar_lea.vmem %s1657_s5, %s1245_s17 }
  0x1e   : > { %631 = vmatprep.subr.bf16.mxu1 %v463_v32 }
  0x1f   : > { %532 = vperm.xlu0 %1335, %v474_v58   ;;  %537 = vperm.xlu1 %1336, %v475_v61  }
  0x20   : > { %1234 = vmatmul.mubr.msk.bf16.gmra.mrb[4].mxu0 %vm600_vm0, %v755_v39 }
  0x21   : > { %632 = vmatpush1.bf16.msra.mxu1 %v462_v35  ;;  %886 = vmatprep.mubr.bf16.mxu0 %v1381_v2 }
  0x23   : > { %542 = vperm.xlu0 %1335, %v476_v0   ;;  %547 = vperm.xlu1 %1336, %v477_v1  }
  0x24   : > { %1217 = vmatmul.mubr.msk.bf16.vlgmr.msra.gmra.mrb[0].mxu1 %vm600_vm0, %v1349_v38 }
  0x25   : > { %667 = vmatprep.mubr.bf16.mxu1 %v1381_v2 }
  0x27   : > { %552 = vperm.xlu0 %1335, %v478_v3   ;;  %557 = vperm.xlu1 %1336, %v479_v6  }
  0x28   : > { %1235 = vmatmul.mubr.msk.bf16.gmra.mrb[8].mxu0 %vm600_vm0, %v756_v47 }
  0x29   : > { %896 = vmatprep.mubr.bf16.mxu0 %v1381_v2 }
  0x2c   : > { %1218 = vmatmul.mubr.msk.bf16.gmra.mrb[4].mxu1 %vm600_vm0, %v1350_v46 }
  0x2d   : > { %677 = vmatprep.mubr.bf16.mxu1 %v1381_v2 }
  0x30   : > { %1236 = vmatmul.mubr.msk.bf16.gmra.mrb[12].mxu0 %vm600_vm0, %v757_v55 }
  0x31   : > { %906 = vmatprep.mubr.bf16.mxu0 %v1381_v2 }
  0x34   : > { %1219 = vmatmul.mubr.msk.bf16.gmra.mrb[8].mxu1 %vm600_vm0, %v1351_v54 }
  0x35   : > { %687 = vmatprep.mubr.bf16.mxu1 %v1381_v2 }
  0x38   : > { %1237 = vmatmul.mubr.msk.bf16.gmra.mrb[16].mxu0 %vm600_vm0, %v758_v63 }
  0x39   : > { %916 = vmatprep.mubr.bf16.mxu0 %v1381_v2 }
  0x3c   : > { %1220 = vmatmul.mubr.msk.bf16.gmra.mrb[12].mxu1 %vm600_vm0, %v1352_v62 }
  0x3d   : > { %697 = vmatprep.mubr.bf16.mxu1 %v1381_v2 }
  0x40   : > { %1238 = vmatmul.mubr.msk.bf16.gmra.mrb[20].mxu0 %vm600_vm0, %v759_v8 }
  0x41   : > { %926 = vmatprep.mubr.bf16.mxu0 %v1381_v2 }
  0x44   : > { %1221 = vmatmul.mubr.msk.bf16.gmra.mrb[16].mxu1 %vm600_vm0, %v1353_v7 }
  0x45   : > { %707 = vmatprep.mubr.bf16.mxu1 %v1381_v2 }
  0x48   : > { %1239 = vmatmul.mubr.msk.bf16.gmra.mrb[24].mxu0 %vm600_vm0, %v760_v12 }
  0x49   : > { %936 = vmatprep.mubr.bf16.mxu0 %v1381_v2 }
  0x4c   : > { %1222 = vmatmul.mubr.msk.bf16.gmra.mrb[20].mxu1 %vm600_vm0, %v1354_v11 }
  0x4d   : > { %717 = vmatprep.mubr.bf16.mxu1 %v1381_v2 }
  0x50   : > { %1240 = vmatmul.mubr.msk.bf16.gmra.mrb[28].mxu0 %vm600_vm0, %v761_v16 }
  0x54   : > { %1223 = vmatmul.mubr.msk.bf16.gmra.mrb[24].mxu1 %vm600_vm0, %v1355_v15 }
  0x55   : > { %727 = vmatprep.mubr.bf16.mxu1 %v1381_v2 }
  0x5c   : > { %1224 = vmatmul.mubr.msk.bf16.gmra.mrb[28].mxu1 %vm600_vm0, %v1356_v17 }
  0x8a   : > { %v483_v19 = vpop.permute.xlu0 %482  ;;  %v493_v23 = vpop.permute.xlu1 %492 }
  0x8e   : > { %v488_v25 = vpop.permute.xlu0 %487  ;;  %v498_v40 = vpop.permute.xlu1 %497 }
  0x92   : > { %v503_v57 = vpop.permute.xlu0 %502  ;;  %v508_v58 = vpop.permute.xlu1 %507 }
  0x96   : > { %v513_v12 = vpop.permute.xlu0 %512  ;;  %v518_v13 = vpop.permute.xlu1 %517 }
  0xeb   : > { %v868_v18 = vpop.f32.mrb[0].mxu0 }
  0xec   : > { %v870_v20 = vpop.f32.mrb[1].mxu0 }
  0xed   : > { %v872_v21 = vpop.f32.mrb[2].mxu0 }
  0xee   : > { %v874_v22 = vpop.f32.mrb[3].mxu0 }
  0xf3   : > { %v878_v2 = vpop.f32.mrb[4].mxu0 }
  0xf4   : > { %v880_v30 = vpop.f32.mrb[5].mxu0 }
  0xf5   : > { %v882_v34 = vpop.f32.mrb[6].mxu0 }
  0xf6   : > { %v884_v37 = vpop.f32.mrb[7].mxu0 }
  0xf7   : > { %v659_v24 = vpop.f32.mrb[0].mxu1 }
  0xf8   : > { %v660_v26 = vadd.f32 %v659_v24, %v483_v19  ;;  %v661_v27 = vpop.f32.mrb[1].mxu1 }
  0xf9   : > { %v662_v28 = vadd.f32 %v661_v27, %v483_v19  ;;  %v663_v29 = vpop.f32.mrb[2].mxu1 }
  0xfa   : > { %v947_v31 = vadd.f32 %v868_v18, %v660_v26  ;;  %v664_v32 = vadd.f32 %v663_v29, %v488_v25  ;;  %v665_v33 = vpop.f32.mrb[3].mxu1  ;;  %v523_v29 = vpop.permute.xlu0 %522 }
  0xfb   : > { %v948_v35 = vadd.f32 %v870_v20, %v662_v28  ;;  %v666_v36 = vadd.f32 %v665_v33, %v488_v25  ;;  %v888_v44 = vpop.f32.mrb[8].mxu0 }
  0xfc   : > { %979 = vst [vmem:[%s1609_s9] sm:$0xff] %v947_v31  ;;  %v949_v38 = vadd.f32 %v872_v21, %v664_v32  ;;  %v890_v47 = vpop.f32.mrb[9].mxu0 }
  0xfd   : > { %980 = vst [vmem:[%s1609_s9 + $0x8] sm:$0xff] %v948_v35  ;;  %v950_v39 = vadd.f32 %v874_v22, %v666_v36  ;;  %v892_v51 = vpop.f32.mrb[10].mxu0 }
  0xfe   : > { %981 = vst [vmem:[%s1609_s9 + $0x10] sm:$0xff] %v949_v38  ;;  %v894_v54 = vpop.f32.mrb[11].mxu0 }
  0xff   : > { %982 = vst [vmem:[%s1609_s9 + $0x18] sm:$0xff] %v950_v39  ;;  %v669_v41 = vpop.f32.mrb[4].mxu1 }
 0x100   : > { %v670_v42 = vadd.f32 %v669_v41, %v493_v23  ;;  %v671_v43 = vpop.f32.mrb[5].mxu1 }
 0x101   : > { %v672_v45 = vadd.f32 %v671_v43, %v493_v23  ;;  %v673_v46 = vpop.f32.mrb[6].mxu1 }
 0x102   : > { %v951_v48 = vadd.f32 %v878_v2, %v670_v42  ;;  %v674_v49 = vadd.f32 %v673_v46, %v498_v40  ;;  %v675_v50 = vpop.f32.mrb[7].mxu1 }
 0x103   : > { %v952_v52 = vadd.f32 %v880_v30, %v672_v45  ;;  %v676_v53 = vadd.f32 %v675_v50, %v498_v40  ;;  %v898_v62 = vpop.f32.mrb[12].mxu0  ;;  %v528_v30 = vpop.permute.xlu1 %527 }
 0x104   : > { %983 = vst [vmem:[%s1609_s9 + $0x20] sm:$0xff] %v951_v48  ;;  %v953_v55 = vadd.f32 %v882_v34, %v674_v49  ;;  %v900_v1 = vpop.f32.mrb[13].mxu0 }
 0x105   : > { %984 = vst [vmem:[%s1609_s9 + $0x28] sm:$0xff] %v952_v52  ;;  %v954_v56 = vadd.f32 %v884_v37, %v676_v53  ;;  %v902_v6 = vpop.f32.mrb[14].mxu0 }
 0x106   : > { %985 = vst [vmem:[%s1609_s9 + $0x30] sm:$0xff] %v953_v55  ;;  %v904_v9 = vpop.f32.mrb[15].mxu0 }
 0x107   : > { %986 = vst [vmem:[%s1609_s9 + $0x38] sm:$0xff] %v954_v56  ;;  %v679_v59 = vpop.f32.mrb[8].mxu1  ;;  %v538_v48 = vpop.permute.xlu1 %537 }
 0x108   : > { %v680_v60 = vadd.f32 %v679_v59, %v503_v57  ;;  %v681_v61 = vpop.f32.mrb[9].mxu1 }
 0x109   : > { %v682_v63 = vadd.f32 %v681_v61, %v503_v57  ;;  %v683_v0 = vpop.f32.mrb[10].mxu1 }
 0x10a   : > { %v955_v3 = vadd.f32 %v888_v44, %v680_v60  ;;  %v684_v4 = vadd.f32 %v683_v0, %v508_v58  ;;  %v685_v5 = vpop.f32.mrb[11].mxu1 }
 0x10b   : > { %v956_v7 = vadd.f32 %v890_v47, %v682_v63  ;;  %v686_v8 = vadd.f32 %v685_v5, %v508_v58  ;;  %v908_v17 = vpop.f32.mrb[16].mxu0  ;;  %v533_v47 = vpop.permute.xlu0 %532 }
 0x10c   : > { %987 = vst [vmem:[%s1609_s9 + $0x40] sm:$0xff] %v955_v3  ;;  %v957_v10 = vadd.f32 %v892_v51, %v684_v4  ;;  %v910_v20 = vpop.f32.mrb[17].mxu0  ;;  %v548_v3 = vpop.permute.xlu1 %547 }
 0x10d   : > { %988 = vst [vmem:[%s1609_s9 + $0x48] sm:$0xff] %v956_v7  ;;  %v958_v11 = vadd.f32 %v894_v54, %v686_v8  ;;  %v912_v24 = vpop.f32.mrb[18].mxu0 }
 0x10e   : > { %989 = vst [vmem:[%s1609_s9 + $0x50] sm:$0xff] %v957_v10  ;;  %v914_v27 = vpop.f32.mrb[19].mxu0 }
 0x10f   : > { %990 = vst [vmem:[%s1609_s9 + $0x58] sm:$0xff] %v958_v11  ;;  %v689_v14 = vpop.f32.mrb[12].mxu1 }
 0x110   : > { %v690_v15 = vadd.f32 %v689_v14, %v513_v12  ;;  %v691_v16 = vpop.f32.mrb[13].mxu1 }
 0x111   : > { %v692_v18 = vadd.f32 %v691_v16, %v513_v12  ;;  %v693_v19 = vpop.f32.mrb[14].mxu1 }
 0x112   : > { %v959_v21 = vadd.f32 %v898_v62, %v690_v15  ;;  %v694_v22 = vadd.f32 %v693_v19, %v518_v13  ;;  %v695_v23 = vpop.f32.mrb[15].mxu1 }
 0x113   : > { %v960_v25 = vadd.f32 %v900_v1, %v692_v18  ;;  %v696_v26 = vadd.f32 %v695_v23, %v518_v13  ;;  %v918_v34 = vpop.f32.mrb[20].mxu0  ;;  %v543_v1 = vpop.permute.xlu0 %542 }
 0x114   : > { %991 = vst [vmem:[%s1609_s9 + $0x60] sm:$0xff] %v959_v21  ;;  %v961_v2 = vadd.f32 %v902_v6, %v694_v22  ;;  %v920_v37 = vpop.f32.mrb[21].mxu0 }
 0x115   : > { %992 = vst [vmem:[%s1609_s9 + $0x68] sm:$0xff] %v960_v25  ;;  %v962_v28 = vadd.f32 %v904_v9, %v696_v26  ;;  %v922_v41 = vpop.f32.mrb[22].mxu0 }
 0x116   : > { %993 = vst [vmem:[%s1609_s9 + $0x70] sm:$0xff] %v961_v2  ;;  %v924_v44 = vpop.f32.mrb[23].mxu0 }
 0x117   : > { %994 = vst [vmem:[%s1609_s9 + $0x78] sm:$0xff] %v962_v28  ;;  %v699_v31 = vpop.f32.mrb[16].mxu1 }
 0x118   : > { %v700_v32 = vadd.f32 %v699_v31, %v523_v29  ;;  %v701_v33 = vpop.f32.mrb[17].mxu1 }
 0x119   : > { %v702_v35 = vadd.f32 %v701_v33, %v523_v29  ;;  %v703_v36 = vpop.f32.mrb[18].mxu1 }
 0x11a   : > { %v963_v38 = vadd.f32 %v908_v17, %v700_v32  ;;  %v704_v39 = vadd.f32 %v703_v36, %v528_v30  ;;  %v705_v40 = vpop.f32.mrb[19].mxu1 }
 0x11b   : > { %v964_v42 = vadd.f32 %v910_v20, %v702_v35  ;;  %v706_v43 = vadd.f32 %v705_v40, %v528_v30  ;;  %v928_v52 = vpop.f32.mrb[24].mxu0  ;;  %v553_v20 = vpop.permute.xlu0 %552 }
 0x11c   : > { %995 = vst [vmem:[%s1609_s9 + $0x80] sm:$0xff] %v963_v38  ;;  %v965_v45 = vadd.f32 %v912_v24, %v704_v39  ;;  %v930_v55 = vpop.f32.mrb[25].mxu0  ;;  %v558_v24 = vpop.permute.xlu1 %557 }
 0x11d   : > { %996 = vst [vmem:[%s1609_s9 + $0x88] sm:$0xff] %v964_v42  ;;  %v966_v46 = vadd.f32 %v914_v27, %v706_v43  ;;  %v932_v59 = vpop.f32.mrb[26].mxu0 }
 0x11e   : > { %997 = vst [vmem:[%s1609_s9 + $0x90] sm:$0xff] %v965_v45  ;;  %v934_v62 = vpop.f32.mrb[27].mxu0 }
 0x11f   : > { %998 = vst [vmem:[%s1609_s9 + $0x98] sm:$0xff] %v966_v46  ;;  %v709_v49 = vpop.f32.mrb[20].mxu1 }
 0x120   : > { %v710_v50 = vadd.f32 %v709_v49, %v533_v47  ;;  %v711_v51 = vpop.f32.mrb[21].mxu1 }
 0x121   : > { %v712_v53 = vadd.f32 %v711_v51, %v533_v47  ;;  %v713_v54 = vpop.f32.mrb[22].mxu1 }
 0x122   : > { %v967_v56 = vadd.f32 %v918_v34, %v710_v50  ;;  %v714_v57 = vadd.f32 %v713_v54, %v538_v48  ;;  %v715_v58 = vpop.f32.mrb[23].mxu1 }
 0x123   : > { %v968_v60 = vadd.f32 %v920_v37, %v712_v53  ;;  %v716_v61 = vadd.f32 %v715_v58, %v538_v48  ;;  %v938_v7 = vpop.f32.mrb[28].mxu0 }
 0x124   : > { %999 = vst [vmem:[%s1609_s9 + $0xa0] sm:$0xff] %v967_v56  ;;  %v969_v63 = vadd.f32 %v922_v41, %v714_v57  ;;  %v940_v10 = vpop.f32.mrb[29].mxu0 }
 0x125   : > { %1000 = vst [vmem:[%s1609_s9 + $0xa8] sm:$0xff] %v968_v60  ;;  %v970_v0 = vadd.f32 %v924_v44, %v716_v61  ;;  %v942_v14 = vpop.f32.mrb[30].mxu0 }
 0x126   : > { %1001 = vst [vmem:[%s1609_s9 + $0xb0] sm:$0xff] %v969_v63  ;;  %v944_v17 = vpop.f32.mrb[31].mxu0 }
 0x127   : > { %1002 = vst [vmem:[%s1609_s9 + $0xb8] sm:$0xff] %v970_v0  ;;  %v719_v4 = vpop.f32.mrb[24].mxu1 }
 0x128   : > { %v720_v5 = vadd.f32 %v719_v4, %v543_v1  ;;  %v721_v6 = vpop.f32.mrb[25].mxu1 }
 0x129   : > { %v722_v8 = vadd.f32 %v721_v6, %v543_v1  ;;  %v723_v9 = vpop.f32.mrb[26].mxu1 }
 0x12a   : > { %v971_v11 = vadd.f32 %v928_v52, %v720_v5  ;;  %v724_v12 = vadd.f32 %v723_v9, %v548_v3  ;;  %v725_v13 = vpop.f32.mrb[27].mxu1 }
 0x12b   : > { %v972_v15 = vadd.f32 %v930_v55, %v722_v8  ;;  %v726_v16 = vadd.f32 %v725_v13, %v548_v3 }
 0x12c   : > { %1003 = vst [vmem:[%s1609_s9 + $0xc0] sm:$0xff] %v971_v11  ;;  %v973_v18 = vadd.f32 %v932_v59, %v724_v12 }
 0x12d   : > { %1004 = vst [vmem:[%s1609_s9 + $0xc8] sm:$0xff] %v972_v15  ;;  %v974_v19 = vadd.f32 %v934_v62, %v726_v16 }
 0x12e   : > { %1005 = vst [vmem:[%s1609_s9 + $0xd0] sm:$0xff] %v973_v18 }
 0x12f   : > { %1006 = vst [vmem:[%s1609_s9 + $0xd8] sm:$0xff] %v974_v19  ;;  %v729_v21 = vpop.f32.mrb[28].mxu1 }
 0x130   : > { %v730_v22 = vadd.f32 %v729_v21, %v553_v20  ;;  %v731_v23 = vpop.f32.mrb[29].mxu1 }
 0x131   : > { %v732_v25 = vadd.f32 %v731_v23, %v553_v20  ;;  %v733_v26 = vpop.f32.mrb[30].mxu1 }
 0x132   : > { %v975_v27 = vadd.f32 %v938_v7, %v730_v22  ;;  %v734_v2 = vadd.f32 %v733_v26, %v558_v24  ;;  %v735_v28 = vpop.f32.mrb[31].mxu1 }
 0x133   : > { %v976_v29 = vadd.f32 %v940_v10, %v732_v25  ;;  %v736_v30 = vadd.f32 %v735_v28, %v558_v24 }
 0x134   : > { %1007 = vst [vmem:[%s1609_s9 + $0xe0] sm:$0xff] %v975_v27  ;;  %v977_v31 = vadd.f32 %v942_v14, %v734_v2 }
 0x135   : > { %1008 = vst [vmem:[%s1609_s9 + $0xe8] sm:$0xff] %v976_v29  ;;  %v978_v32 = vadd.f32 %v944_v17, %v736_v30 }
 0x136   : > { %1009 = vst [vmem:[%s1609_s9 + $0xf0] sm:$0xff] %v977_v31 }
 0x137   : > { %1010 = vst [vmem:[%s1609_s9 + $0xf8] sm:$0xff] %v978_v32 }
 0x138 PF: > { %s15_s20 = sadd.s32 1, %s1379_s20   ;;  %s1658_s18 = smov %s1375_s19 }
 0x139   : > { %p12_p5 = scmp.ge.s32.totalorder %s15_s20, 4   ;;  %s1659_s19 = smov %s1661_s21 }
 0x13b   :  { %14 = sbr.rel (!%p12_p5) target bundleno = 2 (0x2), region = 82 }

</bundles_post_ra>
